<compile_context>
chip_gen: v7x
topology: tpu7x:2x2x1
jax: 0.10.0
libtpu: 0.0.40
codegen_flags: <defaults>
</compile_context>

<pallas_src>
import jax
import jax.numpy as jnp
from jax.experimental import pallas as pl
from jax.experimental.pallas import tpu as pltpu


def _couple_kernel(x_ref, z_ref, o_ref):
    # x_ref: (TILE_ROWS, H) block; z_ref: (1, H) resident zeta row.
    # Casts are no-ops when dtypes already match (native bf16/f32 path); for mixed
    # bf16 * f32 the cast reproduces torch/JAX type promotion exactly.
    od = o_ref.dtype
    o_ref[...] = x_ref[...].astype(od) * z_ref[...].astype(od)


def _sublane_multiple(dtype) -> int:
    # f32 -> 8 rows per sublane tile; bf16 -> 16; int8/fp8 -> 32.
    itemsize = jnp.dtype(dtype).itemsize
    return max(8, 32 // max(1, itemsize))


def _vmem_capacity_bytes() -> int:
    # Conservative fallback = v7x per-TensorCore VMEM (64 MiB).
    try:
        info = pltpu.get_tpu_info()
        cap = getattr(info, "vmem_capacity_bytes", None)
        if cap:
            return int(cap)
    except Exception:
        pass
    return 64 << 20


def _num_tensorcores() -> int:
    # Best-effort: 2 on v7x (megacore), 1 on v5e/v6e. Falls back to 1 (neutral).
    try:
        info = pltpu.get_tpu_info()
        for attr in ("num_cores", "num_tensorcores", "tensorcore_count", "cores_per_chip"):
            v = getattr(info, attr, None)
            if isinstance(v, int) and v > 0:
                return v
        cv = getattr(info, "chip_version", None)
        if cv is not None and "7" in str(cv):
            return 2
    except Exception:
        pass
    return 1


def _round_up(x: int, m: int) -> int:
    return ((x + m - 1) // m) * m


# Measured streaming-elementwise sweet spot is 1-4 MiB per block: enough to hit ~85% of
# the HBM roofline, small enough to leave many grid steps for pipelining / core sharding.
_TARGET_BLOCK_BYTES = 2 << 20


def sparse_couple_forward(x, zeta, *, tile_rows=None, out_dtype=None):
    """x: [B, S, H], zeta: [1, ..., 1, H] -> x * zeta.

    out_dtype=None follows JAX/torch type promotion (bf16 * f32 -> f32). Passing e.g.
    out_dtype=jnp.bfloat16 keeps a bf16-in/bf16-out stream (~1.5x less HBM traffic) at
    the cost of diverging from torch promotion.
    """
    B, S, H = x.shape
    rows = B * S

    assert zeta.shape[-1] == H and all(d == 1 for d in zeta.shape[:-1]), (
        "zeta must broadcast over leading axes with last dim == hidden")

    promoted = jnp.promote_types(x.dtype, zeta.dtype)
    out_dtype = jnp.dtype(promoted if out_dtype is None else out_dtype)

    x2d = x.reshape(rows, H)
    z2d = zeta.reshape(1, H)
    # If the output stays in x's dtype (e.g. bf16-in/bf16-out), cast zeta once on the
    # host so the kernel runs entirely in the native dtype (bf16-native VPU on v6e/v7x).
    if out_dtype == jnp.dtype(x.dtype) and jnp.dtype(z2d.dtype) != out_dtype:
        z2d = z2d.astype(out_dtype)

    x_bytes = jnp.dtype(x.dtype).itemsize
    o_bytes = out_dtype.itemsize
    z_bytes = jnp.dtype(z2d.dtype).itemsize

    sub = max(_sublane_multiple(x.dtype), _sublane_multiple(out_dtype))
    num_tc = _num_tensorcores()
    vmem_cap = _vmem_capacity_bytes()

    if tile_rows is None:
        bytes_per_row = H * max(x_bytes, o_bytes)
        cap_rows = max(sub, (_TARGET_BLOCK_BYTES // max(1, bytes_per_row)) // sub * sub)
        # Enough grid steps for DMA pipelining; >=8 on multi-core chips so each
        # TensorCore gets >=4 steps. Only binds when there is enough work.
        min_steps = 8 if num_tc > 1 else 4
        desired = max(sub, _round_up(pl.cdiv(rows, min_steps), sub))
        tile_rows = min(cap_rows, desired)
    else:
        tile_rows = _round_up(max(int(tile_rows), sub), sub)

    if rows <= tile_rows:
        # Single block equal to the full array (always a legal block shape); avoids any
        # padding and any block > array edge cases.
        tile_rows = rows
    elif num_tc > 1:
        # Nudge the grid to a multiple of the TensorCore count so no core idles a tile.
        g = pl.cdiv(rows, tile_rows)
        if g % num_tc:
            target = _round_up(g, num_tc)
            tr = max(sub, _round_up(pl.cdiv(rows, target), sub))
            if pl.cdiv(rows, tr) % num_tc == 0:
                tile_rows = tr

    grid = pl.cdiv(rows, tile_rows)

    # Honest VMEM footprint: double-buffered x/out blocks + zeta + cast temporaries on the
    # mixed-dtype path + margin; capped at 75% of physical VMEM (v7x has only 64 MiB/TC).
    cast_tmp = tile_rows * H * o_bytes if jnp.dtype(x.dtype) != out_dtype else 0
    footprint = (2 * tile_rows * H * (x_bytes + o_bytes)
                 + 2 * H * z_bytes + cast_tmp + (2 << 20))
    vmem_limit = min(int(vmem_cap * 0.75), max(footprint, 32 << 20))

    cost = pl.CostEstimate(
        flops=rows * H,
        transcendentals=0,
        bytes_accessed=rows * H * (x_bytes + o_bytes) + H * z_bytes,
    )

    out2d = pl.pallas_call(
        _couple_kernel,
        out_shape=jax.ShapeDtypeStruct((rows, H), out_dtype),
        grid_spec=pltpu.PrefetchScalarGridSpec(
            num_scalar_prefetch=0,
            grid=(grid,),
            in_specs=[
                pl.BlockSpec((tile_rows, H), lambda i: (i, 0)),
                pl.BlockSpec((1, H), lambda i: (0, 0)),  # zeta resident across the grid
            ],
            out_specs=pl.BlockSpec((tile_rows, H), lambda i: (i, 0)),
        ),
        compiler_params=pltpu.CompilerParams(
            dimension_semantics=("parallel",),  # row axis sharded across TensorCores
            vmem_limit_bytes=vmem_limit,
        ),
        cost_estimate=cost,
    )(x2d, z2d)

    return out2d.reshape(B, S, H)


if __name__ == "__main__":
    # Transformer-style SparseCouple: batch=2, seq=8, hidden=128, zeta_shapes=[1, 1, 128].
    B, S, H = 2, 8, 128

    key = jax.random.PRNGKey(0)
    x = jax.random.normal(key, (B, S, H), dtype=jnp.float32)

    # nn.Parameter(torch.ones(zeta_shapes)) — perturbed so the multiply is non-trivial.
    zeta = (jnp.ones((1, 1, H), dtype=jnp.float32) * 0.5
            + jnp.arange(H, dtype=jnp.float32).reshape(1, 1, H) * 1e-3)

    out = jax.block_until_ready(sparse_couple_forward(x, zeta))
    ref = x * zeta
    assert out.shape == x.shape
    assert out.dtype == jnp.promote_types(x.dtype, zeta.dtype)
    assert jnp.allclose(out, ref, atol=1e-6, rtol=1e-6)

    # Ragged rows (no host-side pad/slice any more) + mixed bf16 * f32 promotion.
    B2, S2 = 3, 5
    x_bf16 = jax.random.normal(jax.random.PRNGKey(1), (B2, S2, H),
                               dtype=jnp.float32).astype(jnp.bfloat16)
    out2 = jax.block_until_ready(sparse_couple_forward(x_bf16, zeta))
    ref2 = x_bf16 * zeta  # bf16 * f32 -> f32, same as torch
    assert out2.shape == x_bf16.shape and out2.dtype == ref2.dtype
    assert jnp.allclose(out2, ref2, atol=1e-6, rtol=1e-6)

    # Opt-in bf16-in / bf16-out mode (narrow write stream).
    out3 = jax.block_until_ready(
        sparse_couple_forward(x_bf16, zeta, out_dtype=jnp.bfloat16))
    ref3 = x_bf16 * zeta.astype(jnp.bfloat16)
    assert out3.dtype == jnp.bfloat16
    assert jnp.allclose(out3.astype(jnp.float32), ref3.astype(jnp.float32),
                        atol=2e-2, rtol=2e-2)

    print("KERNEL_OK")
</pallas_src>

<mosaic_0001>
module attributes {stable_mosaic.version = 11 : i64} {
  func.func @_couple_kernel(%arg0: i32, %arg1: memref<8x128xf32, #tpu.memory_space<vmem>>, %arg2: memref<1x128xf32, #tpu.memory_space<vmem>>, %arg3: memref<8x128xf32, #tpu.memory_space<vmem>>) attributes {dimension_semantics = [#tpu.dimension_semantics<parallel>], iteration_bounds = array<i64: 2>, scalar_prefetch = 0 : i64, scratch_operands = 0 : i64, tpu.core_type = #tpu.core_type<tc>, window_params = [{transform_indices = @transform_0, window_bounds = array<i64: 8, 128>}, {pipeline_mode = #tpu.pipeline_mode<synchronous>, transform_indices = @transform_1, window_bounds = array<i64: 1, 128>}, {transform_indices = @transform_2, window_bounds = array<i64: 8, 128>}]} {
    %c0 = arith.constant 0 : index
    %c0_0 = arith.constant 0 : index
    %0 = vector.load %arg1[%c0, %c0_0] : memref<8x128xf32, #tpu.memory_space<vmem>>, vector<8x128xf32>
    %c0_1 = arith.constant 0 : index
    %c0_2 = arith.constant 0 : index
    %1 = vector.load %arg2[%c0_1, %c0_2] : memref<1x128xf32, #tpu.memory_space<vmem>>, vector<1x128xf32>
    %2 = vector.broadcast %1 : vector<1x128xf32> to vector<8x128xf32>
    %3 = arith.mulf %0, %2 : vector<8x128xf32>
    %c0_3 = arith.constant 0 : index
    %c0_4 = arith.constant 0 : index
    %4 = vector.load %arg3[%c0_3, %c0_4] : memref<8x128xf32, #tpu.memory_space<vmem>>, vector<8x128xf32>
    tpu.vector_store %arg3[%c0_3, %c0_4], %3 {strides = array<i32>} : memref<8x128xf32, #tpu.memory_space<vmem>>, vector<8x128xf32>,
    return
  }
  func.func @transform_0(%arg0: i32) -> (i32, i32) {
    %c0_i32 = arith.constant 0 : i32
    %c0_i32_0 = arith.constant 0 : i32
    return %arg0, %c0_i32 : i32, i32
  }
  func.func @transform_1(%arg0: i32) -> (i32, i32) {
    %c0_i32 = arith.constant 0 : i32
    %c0_i32_0 = arith.constant 0 : i32
    %c0_i32_1 = arith.constant 0 : i32
    return %c0_i32, %c0_i32_0 : i32, i32
  }
  func.func @transform_2(%arg0: i32) -> (i32, i32) {
    %c0_i32 = arith.constant 0 : i32
    %c0_i32_0 = arith.constant 0 : i32
    return %arg0, %c0_i32 : i32, i32
  }
}

</mosaic_0001>

<bundles_post_ra>
// kernel: tpu_custom_call.1
= control target key start
LH: loop header
LB: loop body
LE: loop exit
PB: predicated region body
PF: predicated region fallthrough
CT: control target
= control target key end

     0   :  { %7 = vsyncpa [#allocation3], 0  ;;  %s591_s0 = inlined_call_operand.hbm [shape: f32[16,128], index: 0, kind: input, shape index: {}]   ;;  %s592_s1 = inlined_call_operand.vmem [shape: f32[1,128], index: 1, kind: input, shape index: {}]   ;;  %s593_s2 = inlined_call_operand.hbm [shape: f32[16,128], index: 2, kind: output, shape index: {}]  }
   0x1   :  { %9 = vsyncpa [#allocation3 + $0x1], 0 }
   0x2   :  { %10 = vsyncpa [#allocation4], 0 }
   0x3   :  { %12 = vsyncpa [#allocation4 + $0x1], 0  ;;  %s427_s9 = smov 0   ;;  %s429_s10 = smov 0  }
   0x4   :  { %s431_s11 = smov 0   ;;  %s433_s12 = smov 0  }
   0x5 LB: > { %s448_s13 = sadd.s32 4294967295, %s408_s12   ;;  %s253_s14 = sadd.s32 4294967294, %s408_s12   ;;  %s408_s12 = sphi %s433_s12, %s608_s12   ;;  %s404_s11 = sphi %s431_s11, %s607_s11   ;;  %s400_s10 = sphi %s429_s10, %s606_s10   ;;  %s396_s9 = sphi %s427_s9, %s605_s9  }
   0x6   : > { %s452_s15 = sadd.s32 1, %s408_s12   ;;  %s25_s16 = sadd.s32 1, %s404_s11 }
   0x7   : > { %s22_s17 = ssub.s32 %s408_s12, %s452_s15  ;;  %p32_p0 = scmp.ne.s32.totalorder %s404_s11, %s400_s10 }
   0x8   : > { %p23_p1 = scmp.eq.s32.totalorder %s22_s17, 0  ;;  %p33_p2 = scmp.eq.s32.totalorder %s408_s12, 0 }
   0x9   : > { %p38_p3 = scmp.ne.s32.totalorder %s400_s10, %s396_s9  ;;  %p39_p4 = scmp.eq.s32.totalorder %s448_s13, 0 }
   0xa   : > { %s464_s18 = scalar_select %p23_p1, %s404_s11, %s25_s16  }
   0xb   : > { %p466_p5 = por %p33_p2, %p32_p0  ;;  %p470_p6 = por %p39_p4, %p38_p3 }
   0xc   : > { %p83_p7 = scmp.eq.s32.totalorder %s448_s13, 1  ;;  %p89_p8 = scmp.eq.s32.totalorder %s253_s14, 1 }
   0xd   : > { %p278_p10 = scmp.lt.s32.totalorder %s408_s12, 2  ;;  %s112_s23 = sand.u32 1, %s404_s11  }
   0xe   : > { %p477_p11 = por %p83_p7, %p32_p0  ;;  %p481_p12 = por %p89_p8, %p38_p3 }
   0xf   : > { %s257_s24 = sshll.u32 %s408_s12, 7  ;;  %s256_s25 = sshll.u32 %s112_s23, 3 }
  0x10   : > { %s597_s21 = scalar_select %p477_p11, 1, 0 }
  0x11   : > { %s598_s22 = scalar_select %p481_p12, 1, 0 }
  0x12   : > { %s490_s28 = scalar_lea.hbm %s591_s0, %s257_s24  ;;  %s116_s29 = scalar_lea.vmem [#allocation2], %s256_s25 }
  0x13   : > { %s123_s30 = sshll.u32 %s116_s29, 4  ;;  %p494_p13 = pnand %p278_p10, %p466_p5  ;;  %s498_s30 = int_to_ptr.vmem [resolvable:$true] %s123_s30 }
  0x14   : > { %s113_s4 = scalar_lea.sflag [#allocation3], %s112_s23  ;;  %s312_s5 = scalar_lea.hbm %s490_s28, 128 }
  0x15   : > { %p313_p2 = scmp.ne.s32.totalorder %s490_s28, %s312_s5  ;;  %p314_p3 = pneg %p494_p13 }
  0x16   : > { %s317_s8 = scalar_lea.hbm %s591_s0, 256  ;;  %p318_p5 = scmp.lt.u32.totalorder %s490_s28, %s591_s0 }
  0x17   : > { %p315_p4 = pnand %p314_p3, %p313_p2  ;;  %p319_p8 = scmp.lt.u32.totalorder %s317_s8, %s312_s5 }
  0x18   : > { %p321_p9 = scmp.lt.u32.totalorder %s312_s5, %s490_s28 }
  0x19   : > { %p316_p7 = pneg %p315_p4  ;;  %p320_p10 = por %p319_p8, %p318_p5 }
  0x1b   : > { %p322_p0 = por %p321_p9, %p320_p10 }
  0x1d   : > { %p323_p1 = pnand %p322_p0, %p316_p7 }
  0x1f   : > { %326 = shalt.err (!%p323_p1)
}
  0x20   : > { %s327_s17 = scalar_lea.vmem %s498_s30, 128  ;;  %s410_s19 = smov [#allocation2]  }
  0x21   : > { %p328_p2 = scmp.ne.s32.totalorder %s498_s30, %s327_s17  ;;  %s332_s23 = sshll.u32 %s410_s19, 4  ;;  %s333_s23 = int_to_ptr.vmem [resolvable:$false] %s332_s23 }
  0x22   : > { %s334_s24 = scalar_lea.vmem %s333_s23, 256  ;;  %p335_p11 = scmp.lt.s32.totalorder %s498_s30, %s333_s23 }
  0x23   : > { %p330_p4 = pnand %p328_p2, %p314_p3  ;;  %p336_p5 = scmp.lt.s32.totalorder %s334_s24, %s327_s17 }
  0x25   : > { %p331_p12 = pneg %p330_p4  ;;  %p337_p8 = por %p336_p5, %p335_p11 }
  0x27   : > { %p338_p9 = pnand %p337_p8, %p331_p12 }
  0x29   : > { %341 = shalt.err (!%p338_p9)
}
  0x2a   : > { %273 = dma.hbm_to_vmem [thread:$0]  (!%p494_p13), %s490_s28, 128, %s498_s30, %s113_s4  }
  0x2b   : > { %p600_p0 = scmp.lt.s32.totalorder %s408_s12, 3  ;;  %p601_p1 = scmp.ge.s32.totalorder %s408_s12, 1 }
  0x2d   : > { %p129_p3 = pnand %p601_p1, %p600_p0 }
  0x2e   : > { %s532_s25 = sand.u32 (!%p129_p3), 1, %s400_s10  }
  0x2f   : > { %132 = sbr.rel (%p129_p3) target bundleno = 81 (0x51), region = 28  ;;  %s259_s26 = sshll.u32 (!%p129_p3), %s532_s25, 3 }
  0x30   : > { %s135_s27 = scalar_lea.sflag (!%p129_p3), [#allocation3], %s532_s25  ;;  %s138_s29 = scalar_lea.vmem (!%p129_p3), [#allocation2], %s259_s26 }
  0x36   : > { %387 = dma.done.wait (%p470_p6), %s135_s27, 128  }
  0x37   : > { %389 = vsyncadd (%p470_p6), %s135_s27, 4294967168  ;;  %s158_s28 = scalar_lea.vmem [#allocation5], %s259_s26  ;;  %s263_s3 = sshll.u32 %s448_s13, 7  ;;  %v159_v0 = vld [vmem:[%s138_s29] sm:$0xff] }
  0x38   : > { %s183_s30 = sshll.u32 %s158_s28, 4  ;;  %v261_v1 = vld [vmem:[%s592_s1] ss:$0 sm:$0xff]  ;;  %s549_s20 = scalar_lea.hbm %s593_s2, %s263_s3  ;;  %s544_s30 = int_to_ptr.vmem [resolvable:$true] %s183_s30 }
  0x39   : > { %v167_v2 = vmul.f32 %v261_v1, %v159_v0  ;;  %s170_s8 = scalar_lea.sflag [#allocation4], %s532_s25  ;;  %s342_s14 = scalar_lea.vmem %s544_s30, 128 }
  0x3a   : > { %p343_p6 = scmp.ne.s32.totalorder %s544_s30, %s342_s14  ;;  %p602_p11 = scmp.ne.s32.totalorder %s597_s21, 0 }
  0x3b   : > { %168 = vst [vmem:[%s158_s28] sm:$0xff] %v167_v2  ;;  %s411_s13 = smov [#allocation5]  }
  0x3c   : > { %p344_p12 = pnand %p343_p6, %p602_p11  ;;  %s346_s16 = sshll.u32 %s411_s13, 4  ;;  %s347_s16 = int_to_ptr.vmem [resolvable:$false] %s346_s16 }
  0x3d   : > { %s348_s17 = scalar_lea.vmem %s347_s16, 256  ;;  %p349_p7 = scmp.lt.s32.totalorder %s544_s30, %s347_s16 }
  0x3e   : > { %p345_p13 = pneg %p344_p12  ;;  %p350_p10 = scmp.lt.s32.totalorder %s348_s17, %s342_s14 }
  0x40   : > { %p351_p2 = por %p350_p10, %p349_p7 }
  0x42   : > { %p352_p4 = pnand %p351_p2, %p345_p13 }
  0x44   : > { %355 = shalt.err (!%p352_p4)
}
  0x45   : > { %s356_s19 = scalar_lea.hbm %s549_s20, 128  ;;  %s360_s25 = scalar_lea.hbm %s593_s2, 256 }
  0x46   : > { %p357_p5 = scmp.ne.s32.totalorder %s549_s20, %s356_s19  ;;  %p361_p0 = scmp.lt.u32.totalorder %s549_s20, %s593_s2 }
  0x47   : > { %p362_p1 = scmp.lt.u32.totalorder %s360_s25, %s356_s19  ;;  %p364_p6 = scmp.lt.u32.totalorder %s356_s19, %s549_s20 }
  0x48   : > { %p358_p8 = pnand %p357_p5, %p602_p11 }
  0x49   : > { %p363_p3 = por %p362_p1, %p361_p0 }
  0x4a   : > { %p359_p9 = pneg %p358_p8 }
  0x4b   : > { %p365_p12 = por %p364_p6, %p363_p3 }
  0x4d   : > { %p366_p13 = pnand %p365_p12, %p359_p9 }
  0x4f   : > { %369 = shalt.err (!%p366_p13)
}
  0x50   : > { %268 = dma.vmem_to_hbm [thread:$0]  (%p602_p11), %s544_s30, 128, %s549_s20, %s170_s8  }
  0x51 PF: > { %s195_s29 = sand.u32 1, %s396_s9   ;;  %p603_p7 = scmp.ne.s32.totalorder %s598_s22, 0 }
  0x52   : > { %p604_p10 = scmp.ge.s32.totalorder %s408_s12, 2  ;;  %s196_s28 = scalar_lea.sflag [#allocation4], %s195_s29 }
  0x54   : > { %p275_p2 = pnand %p604_p10, %p603_p7 }
  0x56   : > { %391 = dma.done.wait (!%p275_p2), %s196_s28, 128  }
  0x57   : > { %393 = vsyncadd (!%p275_p2), %s196_s28, 4294967168  ;;  %p15_p4 = scmp.ge.s32.totalorder %s452_s15, 4   ;;  %s605_s9 = smov %s400_s10 }
  0x58   : > { %s606_s10 = smov %s404_s11  ;;  %s607_s11 = smov %s464_s18 }
  0x59   : > { %s608_s12 = smov %s452_s15  ;;  %17 = sbr.rel (!%p15_p4) target bundleno = 5 (0x5), region = 73 }
  0x60   :  { %201 = vsyncpa [#allocation3], 1 }
  0x61   :  { %203 = vsyncpa [#allocation3 + $0x1], 1 }
  0x62   :  { %204 = vsyncpa [#allocation4], 1 }
  0x63   :  { %206 = vsyncpa [#allocation4 + $0x1], 1 }

</bundles_post_ra>
